<compile_context>
chip_gen: v6e
topology: v6e:2x2x1
jax: 0.10.0
libtpu: 0.0.40
codegen_flags: <defaults>
</compile_context>

<pallas_src>
import math

import jax
import jax.numpy as jnp
from jax import lax
from jax.experimental import pallas as pl
from jax.experimental.pallas import tpu as pltpu


# --------------------------------------------------------------------------- #
# Kernel
# --------------------------------------------------------------------------- #
def _layernorm_kernel(eps):
    def kernel(x_ref, g_ref, b_ref, o_ref):
        x = x_ref[...].astype(jnp.float32)                     # (tm, D)
        n = x.shape[-1]
        mean = jnp.sum(x, axis=-1, keepdims=True) * (1.0 / n)  # (tm, 1)
        d = x - mean
        # Two-pass unbiased variance (torch.std default, /(N-1)); denominator
        # clamped so d_model == 1 does not divide by zero.
        denom = max(n - 1, 1)
        var = jnp.sum(d * d, axis=-1, keepdims=True) * (1.0 / denom)
        std = jnp.sqrt(var)
        # Reference quirk: (x - mean) / sqrt(std + eps) — sqrt of the *std*.
        inv = lax.rsqrt(std + eps)                              # EUP slot, ~free
        out = g_ref[...].astype(jnp.float32) * (d * inv) + b_ref[...].astype(jnp.float32)
        o_ref[...] = out.astype(o_ref.dtype)
    return kernel


# --------------------------------------------------------------------------- #
# Generation-aware sizing helpers
# --------------------------------------------------------------------------- #
def _tpu_vmem_capacity_bytes():
    try:
        return int(pltpu.get_tpu_info().vmem_capacity_bytes)
    except Exception:
        return 64 * 1024 * 1024        # v7x physical floor — conservative default


def _vmem_ceiling_bytes(cap):
    """Most scoped VMEM we will ever request: ~75% of physical.

    Leaves room for compiler-internal scratch — critical on v7x's 64 MiB part
    (48 MiB still admits 8-16 MiB blocks, which sit at >=85% of HBM roofline).
    """
    return int(cap * 0.75)


def _row_tile_budget_max(d_model, in_itemsize, out_itemsize, cap):
    """Largest row tile the VMEM budget admits (dtype-aware accounting).

    Per element: 2 * in_itemsize   (double-buffered input pipeline tile)
               + 2 * out_itemsize  (double-buffered output pipeline tile)
               + 3 * 4             (live f32 temporaries: x, (x-mean)^2, out)
    """
    per_elem = 2 * in_itemsize + 2 * out_itemsize + 3 * 4
    budget = _vmem_ceiling_bytes(cap) - (4 << 20)       # slack for gamma/beta + misc
    return max(8, budget // max(d_model * per_elem, 1))


def _choose_row_tile(rows, d_model, in_itemsize, cap, tm_max):
    """Pick the row tile: HBM-BW bound, so target bytes/step, not rows."""
    two_tc = cap <= (64 << 20) + (1 << 20)              # v7x-class part (2 TCs)
    # Per-step byte target for the input block: bigger steps on the 3.2 TB/s
    # part so the ~0.35 us/step overhead stays <10%; 8 MiB is already >=85% of
    # roofline on 0.8-1.4 TB/s parts and frees VMEM there.
    target_block_bytes = (16 << 20) if two_tc else (8 << 20)
    tm = max(8, target_block_bytes // max(d_model * in_itemsize, 1))
    tm = min(tm, tm_max)
    # Keep enough grid steps for pipelining — and for both TensorCores on v7x.
    min_steps = 8 if two_tc else 4
    if rows >= min_steps * 16:
        tm = min(tm, rows // min_steps)
    tm = max(16, (tm // 16) * 16)       # multiple of 16: f32- and bf16-pack friendly
    if tm >= rows:
        return rows                     # single block == full dim (always legal)
    # Prefer an evenly-dividing tile ONLY if it keeps >= ~half the budget tile;
    # one masked partial tail block is far cheaper than collapsing to tiny tiles.
    lo = max(16, ((tm // 2 + 15) // 16) * 16)
    for cand in range(tm, lo - 1, -16):
        if rows % cand == 0:
            return cand
    return tm                           # cdiv grid; Pallas masks the partial tail


def _vmem_request_bytes(tm, d_model, in_itemsize, out_itemsize, cap):
    """Request only what this kernel needs (plus slack), capped at the ceiling."""
    block = tm * d_model
    needed = 2 * block * in_itemsize + 2 * block * out_itemsize   # pipeline buffers
    needed += 4 * d_model * 4                                     # gamma/beta buffers
    needed = int(needed * 1.5) + (4 << 20)                        # f32 temps + scratch
    return int(max(16 << 20, min(needed, _vmem_ceiling_bytes(cap))))


# --------------------------------------------------------------------------- #
# Wrapper
# --------------------------------------------------------------------------- #
def layer_norm(x, gamma, beta, eps=1e-10, row_tile=None):
    """x: (..., d_model). gamma/beta: (d_model,). Returns same shape/dtype as x."""
    orig_shape = x.shape
    d_model = orig_shape[-1]
    rows = math.prod(orig_shape[:-1]) if len(orig_shape) > 1 else 1
    x2d = x.reshape(rows, d_model)
    g2d = gamma.reshape(1, d_model)
    b2d = beta.reshape(1, d_model)

    in_isz = x.dtype.itemsize
    out_isz = x.dtype.itemsize
    cap = _tpu_vmem_capacity_bytes()
    tm_max = _row_tile_budget_max(d_model, in_isz, out_isz, cap)

    if row_tile is None:
        tm = _choose_row_tile(rows, d_model, in_isz, cap, tm_max)
    else:
        # Validate an explicit override against this generation's VMEM budget
        # (a v6e-sized tile would spill / fail on v7x's 64 MiB otherwise).
        tm = max(8, min(int(row_tile), rows, tm_max))
        if tm < rows:
            tm = max(8, (tm // 8) * 8)   # keep the sublane dim aligned

    grid = pl.cdiv(rows, tm)
    vmem_limit = _vmem_request_bytes(tm, d_model, in_isz, out_isz, cap)

    # NOTE: for production d_model (multiples of 128) loads/stores are lane-
    # dense; a non-multiple feature dim lowers to masked partial stores — still
    # correct, just not lane-optimal (e.g. the d_model=32 self-test below).
    out = pl.pallas_call(
        _layernorm_kernel(eps),
        out_shape=jax.ShapeDtypeStruct((rows, d_model), x.dtype),
        grid_spec=pltpu.PrefetchScalarGridSpec(
            num_scalar_prefetch=0,
            grid=(grid,),
            in_specs=[
                pl.BlockSpec((tm, d_model), lambda i: (i, 0)),
                pl.BlockSpec((1, d_model), lambda i: (0, 0)),
                pl.BlockSpec((1, d_model), lambda i: (0, 0)),
            ],
            out_specs=pl.BlockSpec((tm, d_model), lambda i: (i, 0)),
        ),
        compiler_params=pltpu.CompilerParams(
            dimension_semantics=("parallel",),
            vmem_limit_bytes=int(vmem_limit),
        ),
    )(x2d, g2d, b2d)

    return out.reshape(orig_shape)


# --------------------------------------------------------------------------- #
# Pure-JAX reference (mirrors the PyTorch forward exactly)
# --------------------------------------------------------------------------- #
def layer_norm_ref(x, gamma, beta, eps=1e-10):
    x32 = x.astype(jnp.float32)
    mean = jnp.mean(x32, axis=-1, keepdims=True)
    n = x.shape[-1]
    var = jnp.sum((x32 - mean) ** 2, axis=-1, keepdims=True) / max(n - 1, 1)
    std = jnp.sqrt(var)
    out = (x32 - mean) / jnp.sqrt(std + eps)
    out = gamma.astype(jnp.float32) * out + beta.astype(jnp.float32)
    return out.astype(x.dtype)


if __name__ == "__main__":
    eps = 1e-10
    key = jax.random.PRNGKey(0)

    # Small shape consistent with the module: (batch=2, seq=8, d_model=32).
    batch, seq, d_model = 2, 8, 32
    x = jax.random.normal(key, (batch, seq, d_model), dtype=jnp.float32)
    gamma = jnp.ones((d_model,), dtype=jnp.float32)      # nn.Parameter(torch.ones(d_model))
    beta = jnp.zeros((d_model,), dtype=jnp.float32)      # nn.Parameter(torch.zeros(d_model))

    out = layer_norm(x, gamma, beta, eps=eps)
    out = jax.block_until_ready(out)
    ref = layer_norm_ref(x, gamma, beta, eps=eps)
    assert out.shape == x.shape and out.dtype == x.dtype
    assert jnp.allclose(out, ref, atol=1e-5, rtol=1e-5), "mismatch vs reference"

    # Exercise the cdiv grid with a masked partial tail block + explicit row_tile.
    key2 = jax.random.PRNGKey(1)
    x2 = jax.random.normal(key2, (5, 8, 128), dtype=jnp.float32)   # rows=40, tile=16 -> tail of 8
    g2 = jnp.ones((128,), dtype=jnp.float32)
    b2 = jnp.zeros((128,), dtype=jnp.float32)
    out2 = jax.block_until_ready(layer_norm(x2, g2, b2, eps=eps, row_tile=16))
    ref2 = layer_norm_ref(x2, g2, b2, eps=eps)
    assert jnp.allclose(out2, ref2, atol=1e-5, rtol=1e-5), "mismatch vs reference (tail block)"

    print("KERNEL_OK")
</pallas_src>

<mosaic_0001>
module attributes {stable_mosaic.version = 11 : i64} {
  func.func @kernel(%arg0: i32, %arg1: memref<16x32xf32, #tpu.memory_space<vmem>>, %arg2: memref<1x32xf32, #tpu.memory_space<vmem>>, %arg3: memref<1x32xf32, #tpu.memory_space<vmem>>, %arg4: memref<16x32xf32, #tpu.memory_space<vmem>>) attributes {dimension_semantics = [#tpu.dimension_semantics<parallel>], iteration_bounds = array<i64: 1>, scalar_prefetch = 0 : i64, scratch_operands = 0 : i64, tpu.core_type = #tpu.core_type<tc>, window_params = [{transform_indices = @transform_0, window_bounds = array<i64: 16, 32>}, {pipeline_mode = #tpu.pipeline_mode<synchronous>, transform_indices = @transform_1, window_bounds = array<i64: 1, 32>}, {pipeline_mode = #tpu.pipeline_mode<synchronous>, transform_indices = @transform_2, window_bounds = array<i64: 1, 32>}, {transform_indices = @transform_3, window_bounds = array<i64: 16, 32>}]} {
    %c0 = arith.constant 0 : index
    %c0_0 = arith.constant 0 : index
    %0 = vector.load %arg1[%c0, %c0_0] : memref<16x32xf32, #tpu.memory_space<vmem>>, vector<16x32xf32>
    %cst = arith.constant dense<0.000000e+00> : vector<16xf32>
    %1 = vector.multi_reduction <add>, %0, %cst [1] : vector<16x32xf32> to vector<16xf32>
    %2 = vector.shape_cast %1 : vector<16xf32> to vector<16x1xf32>
    %cst_1 = arith.constant 3.125000e-02 : f32
    %3 = vector.broadcast %cst_1 : f32 to vector<16x1xf32>
    %4 = arith.mulf %2, %3 : vector<16x1xf32>
    %5 = vector.broadcast %4 : vector<16x1xf32> to vector<16x32xf32>
    %6 = arith.subf %0, %5 : vector<16x32xf32>
    %7 = arith.mulf %6, %6 : vector<16x32xf32>
    %cst_2 = arith.constant dense<0.000000e+00> : vector<16xf32>
    %8 = vector.multi_reduction <add>, %7, %cst_2 [1] : vector<16x32xf32> to vector<16xf32>
    %9 = vector.shape_cast %8 : vector<16xf32> to vector<16x1xf32>
    %cst_3 = arith.constant 0.0322580636 : f32
    %10 = vector.broadcast %cst_3 : f32 to vector<16x1xf32>
    %11 = arith.mulf %9, %10 : vector<16x1xf32>
    %12 = math.sqrt %11 : vector<16x1xf32>
    %cst_4 = arith.constant 1.000000e-10 : f32
    %13 = vector.broadcast %cst_4 : f32 to vector<16x1xf32>
    %14 = arith.addf %12, %13 : vector<16x1xf32>
    %15 = math.rsqrt %14 : vector<16x1xf32>
    %c0_5 = arith.constant 0 : index
    %c0_6 = arith.constant 0 : index
    %16 = vector.load %arg2[%c0_5, %c0_6] : memref<1x32xf32, #tpu.memory_space<vmem>>, vector<1x32xf32>
    %17 = vector.broadcast %15 : vector<16x1xf32> to vector<16x32xf32>
    %18 = arith.mulf %6, %17 : vector<16x32xf32>
    %19 = vector.broadcast %16 : vector<1x32xf32> to vector<16x32xf32>
    %20 = arith.mulf %19, %18 : vector<16x32xf32>
    %c0_7 = arith.constant 0 : index
    %c0_8 = arith.constant 0 : index
    %21 = vector.load %arg3[%c0_7, %c0_8] : memref<1x32xf32, #tpu.memory_space<vmem>>, vector<1x32xf32>
    %22 = vector.broadcast %21 : vector<1x32xf32> to vector<16x32xf32>
    %23 = arith.addf %20, %22 : vector<16x32xf32>
    %c0_9 = arith.constant 0 : index
    %c0_10 = arith.constant 0 : index
    %24 = vector.load %arg4[%c0_9, %c0_10] : memref<16x32xf32, #tpu.memory_space<vmem>>, vector<16x32xf32>
    tpu.vector_store %arg4[%c0_9, %c0_10], %23 {strides = array<i32>} : memref<16x32xf32, #tpu.memory_space<vmem>>, vector<16x32xf32>,
    return
  }
  func.func @transform_0(%arg0: i32) -> (i32, i32) {
    %c0_i32 = arith.constant 0 : i32
    %c0_i32_0 = arith.constant 0 : i32
    return %arg0, %c0_i32 : i32, i32
  }
  func.func @transform_1(%arg0: i32) -> (i32, i32) {
    %c0_i32 = arith.constant 0 : i32
    %c0_i32_0 = arith.constant 0 : i32
    %c0_i32_1 = arith.constant 0 : i32
    return %c0_i32, %c0_i32_0 : i32, i32
  }
  func.func @transform_2(%arg0: i32) -> (i32, i32) {
    %c0_i32 = arith.constant 0 : i32
    %c0_i32_0 = arith.constant 0 : i32
    %c0_i32_1 = arith.constant 0 : i32
    return %c0_i32, %c0_i32_0 : i32, i32
  }
  func.func @transform_3(%arg0: i32) -> (i32, i32) {
    %c0_i32 = arith.constant 0 : i32
    %c0_i32_0 = arith.constant 0 : i32
    return %arg0, %c0_i32 : i32, i32
  }
}

</mosaic_0001>

<bundles_post_ra>
// kernel: tpu_custom_call.1
= control target key start
LH: loop header
LB: loop body
LE: loop exit
PB: predicated region body
PF: predicated region fallthrough
CT: control target
= control target key end

     0   :  { %8 = vsyncpa [#allocation3], 0  ;;  %s215_s0 = inlined_call_operand.hbm [shape: f32[16,32], index: 0, kind: input, shape index: {}]   ;;  %s216_s1 = inlined_call_operand.vmem [shape: f32[1,32], index: 1, kind: input, shape index: {}]   ;;  %s217_s2 = inlined_call_operand.vmem [shape: f32[1,32], index: 2, kind: input, shape index: {}]   ;;  %s218_s3 = inlined_call_operand.hbm [shape: f32[16,32], index: 3, kind: output, shape index: {}]  }
   0x1   :  { %9 = vsyncpa [#allocation4], 0  ;;  %s167_s12 = smov [#allocation2]  }
   0x2   :  { %s15_s13 = sshll.u32 %s167_s12, 4  ;;  %s16_s13 = int_to_ptr.vmem [resolvable:$true] %s15_s13 }
   0x3   :  { %s131_s14 = scalar_lea.vmem %s16_s13, 256  ;;  %p136_p1 = scmp.lt.s32.totalorder %s16_s13, %s16_s13 }
   0x4   :  { %p132_p0 = scmp.ne.s32.totalorder %s16_s13, %s131_s14  ;;  %p137_p2 = scmp.lt.s32.totalorder %s131_s14, %s131_s14 }
   0x6   :  { %p138_p3 = por %p137_p2, %p136_p1 }
   0x8   :  { %p139_p4 = pnand %p138_p3, %p132_p0 }
   0xa   :  { %142 = shalt.err (!%p139_p4)
}
   0xb   :  { %s168_s15 = smov 128   ;;  %s169_s16 = smov 8  }
   0xc   :  { %21 = dma.hbm_to_vmem [thread:$0]  %s215_s0, 256, %s16_s13, [#allocation3], %s168_s15, %s168_s15, %s169_s16  }
   0xd   :  { %163 = dma.done.wait [#allocation3], 256  }
   0xe   :  { %164 = vsyncadd [#allocation3], 4294967040  ;;  %vm31_vm0 = vcmask 261120   ;;  %v29_v0 = vld [vmem:[#allocation2] sm:$0xff]  ;;  %v30_v1 = vld [vmem:[#allocation2 + $0x8] sm:$0xff]  ;;  %s170_s22 = smov [#allocation5]  }
   0xf   :  { %v32_v2 = vsel %vm31_vm0, %v29_v0, 0.0  ;;  %v35_v3 = vsel %vm31_vm0, %v30_v1, 0.0  ;;  %v109_v31 = vld [vmem:[%s216_s1] ss:$0 sm:$0xff]  ;;  %s97_s23 = sshll.u32 %s170_s22, 4  ;;  %s98_s23 = int_to_ptr.vmem [resolvable:$true] %s97_s23 }
  0x10   :  { %33 = vadd.xlane.f32.xlu0 %v32_v2  ;;  %v110_v33 = vld [vmem:[%s217_s2] ss:$0 sm:$0xff]  ;;  %s143_s24 = scalar_lea.vmem %s98_s23, 256  ;;  %p148_p6 = scmp.lt.s32.totalorder %s98_s23, %s98_s23 }
  0x11   :  { %p144_p5 = scmp.ne.s32.totalorder %s98_s23, %s143_s24  ;;  %p149_p7 = scmp.lt.s32.totalorder %s143_s24, %s143_s24 }
  0x13   :  { %p150_p8 = por %p149_p7, %p148_p6 }
  0x14   :  { %36 = vadd.xlane.f32.xlu0 %v35_v3 }
  0x15   :  { %p151_p9 = pnand %p150_p8, %p144_p5 }
  0x99   :  { %v34_v4 = vpop.xlane.xlu0 %33 }
  0x9a   :  { %v38_v5 = vmul.f32 0.03125, %v34_v4 }
  0x9c   :  { %v40_v6 = vsub.f32 %v29_v0, %v38_v5 }
  0x9d   :  { %v37_v7 = vpop.xlane.xlu0 %36 }
  0x9e   :  { %v39_v8 = vmul.f32 0.03125, %v37_v7  ;;  %v42_v9 = vmul.f32 %v40_v6, %v40_v6 }
  0xa0   :  { %v41_v10 = vsub.f32 %v30_v1, %v39_v8  ;;  %v44_v11 = vsel %vm31_vm0, %v42_v9, 0.0 }
  0xa1   :  { %45 = vadd.xlane.f32.xlu1 %v44_v11 }
  0xa2   :  { %v43_v12 = vmul.f32 %v41_v10, %v41_v10 }
  0xa4   :  { %v47_v13 = vsel %vm31_vm0, %v43_v12, 0.0 }
  0xa5   :  { %48 = vadd.xlane.f32.xlu1 %v47_v13 }
 0x12a   :  { %v46_v14 = vpop.xlane.xlu1 %45 }
 0x12b   :  { %v50_v15 = vmul.f32 0.032258064, %v46_v14 }
 0x12d   :  { %115 = vrsqrt.f32 %v50_v15  ;;  %vm54_vm1 = vcmp.eq.f32.partialorder %v50_v15, inf  ;;  %v57_v20 = vand.u32 2147483648, %v50_v15  ;;  %vm56_vm2 = vcmp.eq.f32.partialorder %v50_v15, 0.0 }
 0x12e   :  { %v49_v16 = vpop.xlane.xlu1 %48 }
 0x12f   :  { %v51_v17 = vmul.f32 0.032258064, %v49_v16 }
 0x131   :  { %117 = vrsqrt.f32 %v51_v17  ;;  %vm61_vm3 = vcmp.eq.f32.partialorder %v51_v17, inf  ;;  %v64_v26 = vand.u32 2147483648, %v51_v17  ;;  %vm63_vm4 = vcmp.eq.f32.partialorder %v51_v17, 0.0 }
 0x13a   :  { %v116_v18 = vpop.eup %115 }
 0x13b   :  { %v53_v19 = vmul.f32 %v116_v18, %v50_v15 }
 0x13d   :  { %v55_v21 = vsel %vm54_vm1, %v50_v15, %v53_v19 }
 0x13e   :  { %v118_v22 = vpop.eup %117  ;;  %v58_v23 = vsel %vm56_vm2, %v57_v20, %v55_v21 }
 0x13f   :  { %v66_v24 = vadd.f32 1e-10, %v58_v23  ;;  %v60_v25 = vmul.f32 %v118_v22, %v51_v17 }
 0x141   :  { %119 = vrsqrt.f32 %v66_v24  ;;  %v62_v27 = vsel %vm61_vm3, %v51_v17, %v60_v25 }
 0x142   :  { %v65_v28 = vsel %vm63_vm4, %v64_v26, %v62_v27 }
 0x143   :  { %v67_v29 = vadd.f32 1e-10, %v65_v28 }
 0x145   :  { %121 = vrsqrt.f32 %v67_v29 }
 0x14e   :  { %v120_v30 = vpop.eup %119 }
 0x14f   :  { %v71_v32 = vmul.f32 %v120_v30, %v40_v6 }
 0x151   :  { %v79_v34 = vmul.f32 %v109_v31, %v71_v32 }
 0x152   :  { %v122_v35 = vpop.eup %121 }
 0x153   :  { %v72_v36 = vmul.f32 %v122_v35, %v41_v10  ;;  %v88_v37 = vadd.f32 %v110_v33, %v79_v34 }
 0x155   :  { %v80_v38 = vmul.f32 %v109_v31, %v72_v36  ;;  %90 = vst.msk [vmem:[#allocation5] sm:$0xff] %vm31_vm0, %v88_v37 }
 0x157   :  { %v89_v39 = vadd.f32 %v110_v33, %v80_v38 }
 0x159   :  { %91 = vst.msk [vmem:[#allocation5 + $0x8] sm:$0xff] %vm31_vm0, %v89_v39 }
 0x15a   :  { %154 = shalt.err (!%p151_p9)
}
 0x15b   :  { %103 = dma.vmem_to_hbm [thread:$0]  %s98_s23, 256, %s218_s3, [#allocation4], %s168_s15, %s168_s15, %s169_s16  }
 0x15c   :  { %165 = dma.done.wait [#allocation4], 256  }
 0x15d   :  { %166 = vsyncadd [#allocation4], 4294967040 }
 0x15e   :  { %107 = vsyncpa [#allocation3], 1 }
 0x15f   :  { %108 = vsyncpa [#allocation4], 1 }

</bundles_post_ra>
